<compile_context>
chip_gen: v6e
topology: v6e:2x2x1
jax: 0.10.0
libtpu: 0.0.40
codegen_flags: <defaults>
</compile_context>

<pallas_src>
import functools

import jax
import jax.numpy as jnp
from jax.experimental import pallas as pl
from jax.experimental.pallas import tpu as pltpu

LANE = 128
_HIGHEST = jax.lax.Precision.HIGHEST


def _round_up(x, m):
    return ((x + m - 1) // m) * m


def mlp_kernel(batch_ref, x_ref, w1_ref, b1_ref, w2_ref, b2_ref, w3_ref, b3_ref,
               out_ref, pooled_ref, *, n_nodes, needs_mask):
    step = pl.program_id(0)
    tn = x_ref.shape[0]
    g_pad = pooled_ref.shape[0]

    @pl.when(step == 0)
    def _init():
        pooled_ref[...] = jnp.zeros_like(pooled_ref)

    x = x_ref[...]                                   # [TN, D]   f32
    bidx = batch_ref[...]                            # [1, TN]   i32

    if needs_mask:  # static: only emitted when the last node tile is ragged
        # Rows >= N of the final tile are undefined (no wrapper-side padding):
        # zero their features and force their batch id to -1 so they never
        # contribute to any graph row.
        row = jax.lax.broadcasted_iota(jnp.int32, (tn, 1), 0) + step * tn
        x = jnp.where(row < n_nodes, x, 0.0)
        col = jax.lax.broadcasted_iota(jnp.int32, (1, tn), 1) + step * tn
        bidx = jnp.where(col < n_nodes, bidx, -1)

    # scatter_add(x, batch) for this node tile as a one-hot matmul (MXU).
    # One-hot footprint is bounded to [G_pad, TN] per grid step.
    graph_ids = jax.lax.broadcasted_iota(jnp.int32, (g_pad, tn), 0)   # [G_pad, TN]
    onehot = (graph_ids == bidx).astype(jnp.float32)                  # [G_pad, TN]
    pooled_ref[...] += jnp.dot(onehot, x, precision=_HIGHEST,
                               preferred_element_type=jnp.float32)

    @pl.when(step == pl.num_programs(0) - 1)
    def _epilogue():
        # Dropout(0.05)/Dropout(0.35) are identity in eval mode.
        pooled = pooled_ref[...]                                      # [G_pad, D]
        h = jnp.dot(pooled, w1_ref[...], precision=_HIGHEST,
                    preferred_element_type=jnp.float32) + b1_ref[...]
        h = jnp.maximum(h, 0.0)
        h = jnp.dot(h, w2_ref[...], precision=_HIGHEST,
                    preferred_element_type=jnp.float32) + b2_ref[...]
        h = jnp.maximum(h, 0.0)
        out = jnp.dot(h, w3_ref[...], precision=_HIGHEST,
                      preferred_element_type=jnp.float32) + b3_ref[...]
        out_ref[...] = out.astype(out_ref.dtype)                      # [G_pad, 128]


@functools.partial(jax.jit, static_argnames=("num_graphs", "node_tile"))
def mlp_forward(x, batch, num_graphs, params, *, node_tile=2048):
    """x: [N, D] f32, batch: [N] int, params: (w1,b1,w2,b2,w3,b3) with W as [in,out]."""
    w1, b1, w2, b2, w3, b3 = params
    N, D = x.shape
    H = w1.shape[1]

    # ---- Node-axis tiling (no padded copy of x / batch is ever materialized).
    tn_cap = _round_up(node_tile, LANE)
    if N <= tn_cap:
        TN, needs_mask = N, False          # single full-array block (always legal)
    else:
        TN, needs_mask = tn_cap, (N % tn_cap) != 0
    num_steps = -(-N // TN)

    G_pad = _round_up(max(num_graphs, 8), 8)

    # ---- Small host-side reshapes / tiny padding only (never on x).
    x = x.astype(jnp.float32)
    batch2d = batch.astype(jnp.int32).reshape(1, N)
    w1f = w1.astype(jnp.float32)
    w2f = w2.astype(jnp.float32)
    b1r = b1.astype(jnp.float32).reshape(1, H)
    b2r = b2.astype(jnp.float32).reshape(1, H)
    # Lane-dense output: pad only the tiny last layer to 128 columns.
    w3_p = jnp.zeros((H, LANE), jnp.float32).at[:, :1].set(w3.astype(jnp.float32))
    b3_p = jnp.zeros((1, LANE), jnp.float32).at[0, :1].set(b3.astype(jnp.float32))

    # ---- VMEM budget (capped at 48 MiB so it also fits v7x's 64 MiB part).
    d_lane = _round_up(D, LANE)
    h_lane = _round_up(H, LANE)
    weight_bytes = 4 * (_round_up(D, 8) * h_lane     # w1
                        + _round_up(H, 8) * h_lane   # w2
                        + _round_up(H, 8) * LANE     # w3
                        + 3 * 8 * max(h_lane, LANE)) # biases (sublane-padded)
    est = (2 * _round_up(TN, 8) * d_lane * 4         # x, double-buffered
           + 2 * 8 * _round_up(TN, LANE) * 4         # batch ids, double-buffered
           + weight_bytes                            # weights (>=1 buffer)
           + G_pad * d_lane * 4                      # pooled accumulator
           + 2 * G_pad * LANE * 4)                   # output block
    vmem_limit = int(min(max(2 * est, 32 * 1024 * 1024), 48 * 1024 * 1024))

    # Weights/biases have constant index maps; default double-buffering only
    # hurts once hidden_dim is large, so request single buffering there and
    # keep the plain (battle-tested) spec for the small case.
    use_single_buffer = weight_bytes > (4 * 1024 * 1024)

    def const_spec(shape):
        if use_single_buffer:
            return pl.BlockSpec(shape, lambda i: (0, 0),
                                pipeline_mode=pl.Buffered(1))
        return pl.BlockSpec(shape, lambda i: (0, 0))

    kernel = functools.partial(mlp_kernel, n_nodes=N, needs_mask=needs_mask)

    out_padded = pl.pallas_call(
        kernel,
        out_shape=jax.ShapeDtypeStruct((G_pad, LANE), jnp.float32),
        grid_spec=pltpu.PrefetchScalarGridSpec(
            num_scalar_prefetch=0,
            grid=(num_steps,),
            in_specs=[
                pl.BlockSpec((1, TN), lambda i: (0, i)),     # batch ids (streamed)
                pl.BlockSpec((TN, D), lambda i: (i, 0)),     # node features (streamed)
                const_spec((D, H)),                          # w1 (resident)
                const_spec((1, H)),                          # b1
                const_spec((H, H)),                          # w2
                const_spec((1, H)),                          # b2
                const_spec((H, LANE)),                       # w3 (lane-dense padded)
                const_spec((1, LANE)),                       # b3
            ],
            out_specs=pl.BlockSpec((G_pad, LANE), lambda i: (0, 0)),
            scratch_shapes=[pltpu.VMEM((G_pad, D), jnp.float32)],  # pooled accumulator
        ),
        compiler_params=pltpu.CompilerParams(
            dimension_semantics=("arbitrary",),              # node axis is a reduction
            vmem_limit_bytes=vmem_limit,
        ),
    )(batch2d, x, w1f, b1r, w2f, b2r, w3_p, b3_p)

    # Slice away graph/lane padding -> [G, 1].
    return out_padded[:num_graphs, :1]


def init_params(key, input_dim, hidden_dim):
    """Deterministic PyTorch-Linear-style init (uniform +-1/sqrt(fan_in)).
    Weights stored as [in, out] so the kernel computes x @ W."""
    ks = jax.random.split(key, 6)

    def lin(kw, kb, fan_in, fan_out):
        bound = 1.0 / jnp.sqrt(fan_in)
        w = jax.random.uniform(kw, (fan_in, fan_out), jnp.float32, -bound, bound)
        b = jax.random.uniform(kb, (fan_out,), jnp.float32, -bound, bound)
        return w, b

    w1, b1 = lin(ks[0], ks[1], input_dim, hidden_dim)
    w2, b2 = lin(ks[2], ks[3], hidden_dim, hidden_dim)
    w3, b3 = lin(ks[4], ks[5], hidden_dim, 1)
    return (w1, b1, w2, b2, w3, b3)


def mlp_reference(x, batch, num_graphs, params):
    w1, b1, w2, b2, w3, b3 = params
    pooled = (jnp.zeros((num_graphs, x.shape[1]), jnp.float32)
              .at[batch].add(x.astype(jnp.float32)))
    h = jnp.maximum(jnp.dot(pooled, w1, precision=_HIGHEST) + b1, 0.0)
    h = jnp.maximum(jnp.dot(h, w2, precision=_HIGHEST) + b2, 0.0)
    return jnp.dot(h, w3, precision=_HIGHEST) + b3


if __name__ == "__main__":
    key = jax.random.PRNGKey(0)
    k_x, k_p, k_x2, k_b2 = jax.random.split(key, 4)

    # Small demo consistent with the module: 8 nodes, input_dim=16, hidden=32, 2 graphs.
    N, D, H, G = 8, 16, 32, 2
    x = jax.random.normal(k_x, (N, D), jnp.float32)
    batch = jnp.array([0, 0, 0, 0, 1, 1, 1, 1], jnp.int32)
    params = init_params(k_p, D, H)

    out = jax.block_until_ready(mlp_forward(x, batch, G, params))
    ref = mlp_reference(x, batch, G, params)
    assert out.shape == (G, 1)
    assert jnp.allclose(out, ref, atol=1e-4, rtol=1e-4), (out, ref)

    # Multi-tile case with a ragged final tile (exercises the in-kernel masking
    # that replaced the wrapper-side zero-padding of x).
    N2, G2 = 300, 5
    x2 = jax.random.normal(k_x2, (N2, D), jnp.float32)
    batch2 = jax.random.randint(k_b2, (N2,), 0, G2, jnp.int32)
    out2 = jax.block_until_ready(mlp_forward(x2, batch2, G2, params, node_tile=128))
    ref2 = mlp_reference(x2, batch2, G2, params)
    assert out2.shape == (G2, 1)
    assert jnp.allclose(out2, ref2, atol=1e-4, rtol=1e-4), (out2, ref2)

    print("KERNEL_OK")
</pallas_src>

<mosaic_0001>
module attributes {stable_mosaic.version = 11 : i64} {
  func.func @mlp_kernel(%arg0: i32, %arg1: memref<1x8xi32, #tpu.memory_space<vmem>>, %arg2: memref<8x16xf32, #tpu.memory_space<vmem>>, %arg3: memref<16x32xf32, #tpu.memory_space<vmem>>, %arg4: memref<1x32xf32, #tpu.memory_space<vmem>>, %arg5: memref<32x32xf32, #tpu.memory_space<vmem>>, %arg6: memref<1x32xf32, #tpu.memory_space<vmem>>, %arg7: memref<32x128xf32, #tpu.memory_space<vmem>>, %arg8: memref<1x128xf32, #tpu.memory_space<vmem>>, %arg9: memref<8x128xf32, #tpu.memory_space<vmem>>, %arg10: memref<8x16xf32, #tpu.memory_space<vmem>>) attributes {dimension_semantics = [#tpu.dimension_semantics<arbitrary>], iteration_bounds = array<i64: 1>, scalar_prefetch = 0 : i64, scratch_operands = 1 : i64, tpu.core_type = #tpu.core_type<tc>, window_params = [{transform_indices = @transform_0, window_bounds = array<i64: 1, 8>}, {transform_indices = @transform_1, window_bounds = array<i64: 8, 16>}, {pipeline_mode = #tpu.pipeline_mode<synchronous>, transform_indices = @transform_2, window_bounds = array<i64: 16, 32>}, {pipeline_mode = #tpu.pipeline_mode<synchronous>, transform_indices = @transform_3, window_bounds = array<i64: 1, 32>}, {pipeline_mode = #tpu.pipeline_mode<synchronous>, transform_indices = @transform_4, window_bounds = array<i64: 32, 32>}, {pipeline_mode = #tpu.pipeline_mode<synchronous>, transform_indices = @transform_5, window_bounds = array<i64: 1, 32>}, {pipeline_mode = #tpu.pipeline_mode<synchronous>, transform_indices = @transform_6, window_bounds = array<i64: 32, 128>}, {pipeline_mode = #tpu.pipeline_mode<synchronous>, transform_indices = @transform_7, window_bounds = array<i64: 1, 128>}, {pipeline_mode = #tpu.pipeline_mode<synchronous>, transform_indices = @transform_8, window_bounds = array<i64: 8, 128>}]} {
    %c0_i32 = arith.constant 0 : i32
    %0 = arith.cmpi eq, %arg0, %c0_i32 : i32
    %1 = arith.extui %0 : i1 to i32
    %c0_i32_0 = arith.constant 0 : i32
    %2 = arith.cmpi ne, %1, %c0_i32_0 : i32
    scf.if %2 {
      %cst_10 = arith.constant 0.000000e+00 : f32
      %17 = vector.broadcast %cst_10 : f32 to vector<8x16xf32>
      %c0_11 = arith.constant 0 : index
      %c0_12 = arith.constant 0 : index
      %18 = vector.load %arg10[%c0_11, %c0_12] : memref<8x16xf32, #tpu.memory_space<vmem>>, vector<8x16xf32>
      tpu.vector_store %arg10[%c0_11, %c0_12], %17 {strides = array<i32>} : memref<8x16xf32, #tpu.memory_space<vmem>>, vector<8x16xf32>,
    } else {
    }
    %c0 = arith.constant 0 : index
    %c0_1 = arith.constant 0 : index
    %3 = vector.load %arg2[%c0, %c0_1] : memref<8x16xf32, #tpu.memory_space<vmem>>, vector<8x16xf32>
    %c0_2 = arith.constant 0 : index
    %c0_3 = arith.constant 0 : index
    %4 = vector.load %arg1[%c0_2, %c0_3] : memref<1x8xi32, #tpu.memory_space<vmem>>, vector<1x8xi32>
    %5 = tpu.iota {dimensions = array<i32: 0>} : vector<8x8xi32>
    %6 = vector.broadcast %4 : vector<1x8xi32> to vector<8x8xi32>
    %7 = arith.cmpi eq, %5, %6 : vector<8x8xi32>
    %8 = arith.extui %7 : vector<8x8xi1> to vector<8x8xi32>
    %9 = arith.sitofp %8 : vector<8x8xi32> to vector<8x8xf32>
    %c0_4 = arith.constant 0 : index
    %c0_5 = arith.constant 0 : index
    %10 = vector.load %arg10[%c0_4, %c0_5] : memref<8x16xf32, #tpu.memory_space<vmem>>, vector<8x16xf32>
    %cst = arith.constant dense<0.000000e+00> : vector<8x16xf32>
    %11 = tpu.matmul %9, %3, %cst {dimension_numbers = #tpu.dot_dimension_numbers<[1], [0], [0], [1], [0, 0, 1, 1], [], []>, precision = #tpu.contract_precision<fp32>} : vector<8x8xf32>, vector<8x16xf32>, vector<8x16xf32> -> vector<8x16xf32>
    %12 = arith.addf %10, %11 : vector<8x16xf32>
    %c0_6 = arith.constant 0 : index
    %c0_7 = arith.constant 0 : index
    %13 = vector.load %arg10[%c0_6, %c0_7] : memref<8x16xf32, #tpu.memory_space<vmem>>, vector<8x16xf32>
    tpu.vector_store %arg10[%c0_6, %c0_7], %12 {strides = array<i32>} : memref<8x16xf32, #tpu.memory_space<vmem>>, vector<8x16xf32>,
    %c0_i32_8 = arith.constant 0 : i32
    %14 = arith.cmpi eq, %arg0, %c0_i32_8 : i32
    %15 = arith.extui %14 : i1 to i32
    %c0_i32_9 = arith.constant 0 : i32
    %16 = arith.cmpi ne, %15, %c0_i32_9 : i32
    scf.if %16 {
      %c0_10 = arith.constant 0 : index
      %c0_11 = arith.constant 0 : index
      %17 = vector.load %arg10[%c0_10, %c0_11] : memref<8x16xf32, #tpu.memory_space<vmem>>, vector<8x16xf32>
      %c0_12 = arith.constant 0 : index
      %c0_13 = arith.constant 0 : index
      %18 = vector.load %arg3[%c0_12, %c0_13] : memref<16x32xf32, #tpu.memory_space<vmem>>, vector<16x32xf32>
      %cst_14 = arith.constant dense<0.000000e+00> : vector<8x32xf32>
      %19 = tpu.matmul %17, %18, %cst_14 {dimension_numbers = #tpu.dot_dimension_numbers<[1], [0], [0], [1], [0, 0, 1, 1], [], []>, precision = #tpu.contract_precision<fp32>} : vector<8x16xf32>, vector<16x32xf32>, vector<8x32xf32> -> vector<8x32xf32>
      %c0_15 = arith.constant 0 : index
      %c0_16 = arith.constant 0 : index
      %20 = vector.load %arg4[%c0_15, %c0_16] : memref<1x32xf32, #tpu.memory_space<vmem>>, vector<1x32xf32>
      %21 = vector.broadcast %20 : vector<1x32xf32> to vector<8x32xf32>
      %22 = arith.addf %19, %21 : vector<8x32xf32>
      %cst_17 = arith.constant 0.000000e+00 : f32
      %23 = vector.broadcast %cst_17 : f32 to vector<8x32xf32>
      %24 = arith.maximumf %22, %23 : vector<8x32xf32>
      %c0_18 = arith.constant 0 : index
      %c0_19 = arith.constant 0 : index
      %25 = vector.load %arg5[%c0_18, %c0_19] : memref<32x32xf32, #tpu.memory_space<vmem>>, vector<32x32xf32>
      %cst_20 = arith.constant dense<0.000000e+00> : vector<8x32xf32>
      %26 = tpu.matmul %24, %25, %cst_20 {dimension_numbers = #tpu.dot_dimension_numbers<[1], [0], [0], [1], [0, 0, 1, 1], [], []>, precision = #tpu.contract_precision<fp32>} : vector<8x32xf32>, vector<32x32xf32>, vector<8x32xf32> -> vector<8x32xf32>
      %c0_21 = arith.constant 0 : index
      %c0_22 = arith.constant 0 : index
      %27 = vector.load %arg6[%c0_21, %c0_22] : memref<1x32xf32, #tpu.memory_space<vmem>>, vector<1x32xf32>
      %28 = vector.broadcast %27 : vector<1x32xf32> to vector<8x32xf32>
      %29 = arith.addf %26, %28 : vector<8x32xf32>
      %cst_23 = arith.constant 0.000000e+00 : f32
      %30 = vector.broadcast %cst_23 : f32 to vector<8x32xf32>
      %31 = arith.maximumf %29, %30 : vector<8x32xf32>
      %c0_24 = arith.constant 0 : index
      %c0_25 = arith.constant 0 : index
      %32 = vector.load %arg7[%c0_24, %c0_25] : memref<32x128xf32, #tpu.memory_space<vmem>>, vector<32x128xf32>
      %cst_26 = arith.constant dense<0.000000e+00> : vector<8x128xf32>
      %33 = tpu.matmul %31, %32, %cst_26 {dimension_numbers = #tpu.dot_dimension_numbers<[1], [0], [0], [1], [0, 0, 1, 1], [], []>, precision = #tpu.contract_precision<fp32>} : vector<8x32xf32>, vector<32x128xf32>, vector<8x128xf32> -> vector<8x128xf32>
      %c0_27 = arith.constant 0 : index
      %c0_28 = arith.constant 0 : index
      %34 = vector.load %arg8[%c0_27, %c0_28] : memref<1x128xf32, #tpu.memory_space<vmem>>, vector<1x128xf32>
      %35 = vector.broadcast %34 : vector<1x128xf32> to vector<8x128xf32>
      %36 = arith.addf %33, %35 : vector<8x128xf32>
      %c0_29 = arith.constant 0 : index
      %c0_30 = arith.constant 0 : index
      %37 = vector.load %arg9[%c0_29, %c0_30] : memref<8x128xf32, #tpu.memory_space<vmem>>, vector<8x128xf32>
      tpu.vector_store %arg9[%c0_29, %c0_30], %36 {strides = array<i32>} : memref<8x128xf32, #tpu.memory_space<vmem>>, vector<8x128xf32>,
    } else {
    }
    return
  }
  func.func @transform_0(%arg0: i32) -> (i32, i32) {
    %c0_i32 = arith.constant 0 : i32
    %c0_i32_0 = arith.constant 0 : i32
    return %c0_i32, %arg0 : i32, i32
  }
  func.func @transform_1(%arg0: i32) -> (i32, i32) {
    %c0_i32 = arith.constant 0 : i32
    %c0_i32_0 = arith.constant 0 : i32
    return %arg0, %c0_i32 : i32, i32
  }
  func.func @transform_2(%arg0: i32) -> (i32, i32) {
    %c0_i32 = arith.constant 0 : i32
    %c0_i32_0 = arith.constant 0 : i32
    %c0_i32_1 = arith.constant 0 : i32
    return %c0_i32, %c0_i32_0 : i32, i32
  }
  func.func @transform_3(%arg0: i32) -> (i32, i32) {
    %c0_i32 = arith.constant 0 : i32
    %c0_i32_0 = arith.constant 0 : i32
    %c0_i32_1 = arith.constant 0 : i32
    return %c0_i32, %c0_i32_0 : i32, i32
  }
  func.func @transform_4(%arg0: i32) -> (i32, i32) {
    %c0_i32 = arith.constant 0 : i32
    %c0_i32_0 = arith.constant 0 : i32
    %c0_i32_1 = arith.constant 0 : i32
    return %c0_i32, %c0_i32_0 : i32, i32
  }
  func.func @transform_5(%arg0: i32) -> (i32, i32) {
    %c0_i32 = arith.constant 0 : i32
    %c0_i32_0 = arith.constant 0 : i32
    %c0_i32_1 = arith.constant 0 : i32
    return %c0_i32, %c0_i32_0 : i32, i32
  }
  func.func @transform_6(%arg0: i32) -> (i32, i32) {
    %c0_i32 = arith.constant 0 : i32
    %c0_i32_0 = arith.constant 0 : i32
    %c0_i32_1 = arith.constant 0 : i32
    return %c0_i32, %c0_i32_0 : i32, i32
  }
  func.func @transform_7(%arg0: i32) -> (i32, i32) {
    %c0_i32 = arith.constant 0 : i32
    %c0_i32_0 = arith.constant 0 : i32
    %c0_i32_1 = arith.constant 0 : i32
    return %c0_i32, %c0_i32_0 : i32, i32
  }
  func.func @transform_8(%arg0: i32) -> (i32, i32) {
    %c0_i32 = arith.constant 0 : i32
    %c0_i32_0 = arith.constant 0 : i32
    %c0_i32_1 = arith.constant 0 : i32
    return %c0_i32, %c0_i32_0 : i32, i32
  }
}

</mosaic_0001>

<bundles_post_ra>
// kernel: mlp_forward.1
= control target key start
LH: loop header
LB: loop body
LE: loop exit
PB: predicated region body
PF: predicated region fallthrough
CT: control target
= control target key end

     0   :  { %v37_v0 = vlaneseq  ;;  %v2285_v1 = vmov 0.0   ;;  %vm2286_vm0 = vmmov 0   ;;  %vm47_vm1 = vcmask 64512   ;;  %s2635_s1 = inlined_call_operand.vmem [shape: f32[8,16], index: 1, kind: input, shape index: {}]   ;;  %s2636_s0 = inlined_call_operand.vmem [shape: s32[1,8], index: 0, kind: input, shape index: {}]   ;;  %s2637_s2 = inlined_call_operand.vmem [shape: f32[16,32], index: 2, kind: input, shape index: {}]   ;;  %s2638_s4 = inlined_call_operand.vmem [shape: f32[32,32], index: 4, kind: input, shape index: {}]   ;;  %s2639_s3 = inlined_call_operand.vmem [shape: f32[1,32], index: 3, kind: input, shape index: {}]   ;;  %s2640_s6 = inlined_call_operand.vmem [shape: f32[32,128], index: 6, kind: input, shape index: {}]   ;;  %s2641_s5 = inlined_call_operand.vmem [shape: f32[1,32], index: 5, kind: input, shape index: {}]   ;;  %s2642_s7 = inlined_call_operand.vmem [shape: f32[1,128], index: 7, kind: input, shape index: {}]   ;;  %s2643_s8 = inlined_call_operand.vmem [shape: f32[8,128], index: 8, kind: output, shape index: {}]  }
   0x1   :  { %2079 = vmatprep.subr.mxu0 %v2285_v1  ;;  %v35_v2 = vld [vmem:[%s2635_s1] sm:$0xff]  ;;  %2084 = vmatprep.subr.mxu1 %v2285_v1  ;;  %vm33_vm3 = vcmask 130048   ;;  %v505_v16 = vld [vmem:[%s2637_s2 + $0x8] sm:$0xff]  ;;  %v979_v54 = vld [vmem:[%s2638_s4 + $0x18] sm:$0xff]  ;;  %vm987_vm4 = vcmask 261120  }
   0x2   :  { %v1981_v3 = vld [vmem:[%s2636_s0] ss:$0 sm:$0xff]  ;;  %v82_v4 = vand.u32 4294901760, %v35_v2  ;;  %2081 = vmatprep.mubr.msk.f32.mxu0 %vm2286_vm0, %v2285_v1  ;;  %2086 = vmatprep.mubr.msk.f32.mxu1 %vm2286_vm0, %v2285_v1  ;;  %v38_v5 = vshrl.u32 %v37_v0, 7  ;;  %34 = vst.msk [vmem:[#allocation2] sm:$0xff] %vm33_vm3, %v2285_v1  ;;  %v545_v17 = vand.u32 4294901760, %v505_v16 }
   0x3   :  { %v504_v18 = vld [vmem:[%s2637_s2] sm:$0xff]  ;;  %v2414_v55 = vand.u32 4294901760, %v979_v54  ;;  %v978_v56 = vld [vmem:[%s2638_s4 + $0x10] sm:$0xff]  ;;  %v977_v59 = vld [vmem:[%s2638_s4 + $0x8] sm:$0xff] }
   0x4   :  { %2080 = vmatpush3.msra.mxu0 %v82_v4  ;;  %v159_v6 = vsub.f32 %v35_v2, %v82_v4  ;;  %vm43_vm2 = vcmp.eq.s32.totalorder %v38_v5, %v1981_v3  ;;  %v2375_v19 = vsub.f32 %v505_v16, %v545_v17  ;;  %v548_v20 = vand.u32 4294901760, %v504_v18  ;;  %v976_v63 = vld [vmem:[%s2638_s4] sm:$0xff] }
   0x5   :  { %2089 = vmatprep.subr.mxu0 %v2285_v1  ;;  %v1982_v7 = vsel %vm43_vm2, 1.0, %v2285_v1  ;;  %v2420_v57 = vsub.f32 %v979_v54, %v2414_v55  ;;  %v2422_v58 = vand.u32 4294901760, %v978_v56  ;;  %v2433_v62 = vand.u32 4294901760, %v977_v59 }
   0x6   :  { %v160_v8 = vand.u32 4294901760, %v159_v6  ;;  %v49_v9 = vsel %vm47_vm1, %v1982_v7, 0  ;;  %v624_v21 = vand.u32 4294901760, %v2375_v19  ;;  %v2379_v22 = vsub.f32 %v504_v18, %v548_v20 }
   0x7   :  { %v118_v10 = vsub.f32 %v49_v9, %v49_v9  ;;  %v1097_v60 = vand.u32 4294901760, %v2420_v57  ;;  %v2431_v61 = vsub.f32 %v978_v56, %v2422_v58  ;;  %v2445_v3 = vsub.f32 %v977_v59, %v2433_v62 }
   0x8   :  { %v161_v11 = vsub.f32 %v159_v6, %v160_v8  ;;  %v625_v23 = vsub.f32 %v2375_v19, %v624_v21  ;;  %v631_v24 = vand.u32 4294901760, %v2379_v22 }
   0x9   :  { %v119_v12 = vand.u32 4294901760, %v118_v10  ;;  %v46_v43 = vld [vmem:[#allocation2] sm:$0xff]  ;;  %v1098_v0 = vsub.f32 %v2420_v57, %v1097_v60  ;;  %v1104_v2 = vand.u32 4294901760, %v2431_v61 }
   0xa   :  { %v162_v13 = vand.u32 4294901760, %v161_v11  ;;  %v626_v25 = vand.u32 4294901760, %v625_v23  ;;  %v632_v26 = vsub.f32 %v2379_v22, %v631_v24 }
   0xb   :  { %v120_v14 = vsub.f32 %v118_v10, %v119_v12  ;;  %v1099_v5 = vand.u32 4294901760, %v1098_v0 }
   0xc   :  { %2085 = vmatpush3.msra.mxu1 %v162_v13  ;;  %v633_v27 = vand.u32 4294901760, %v632_v26 }
   0xd   :  { %v121_v15 = vand.u32 4294901760, %v120_v14  ;;  %2087 = vmatmul.mubr.msk.f32.vlgmr.msra.gmra.mxu1 %vm47_vm1, %v1982_v7  ;;  %2094 = vmatprep.subr.mxu1 %v2285_v1 }
   0xe   :  { %2095 = vmatpush3.msra.mxu1 %v82_v4  ;;  %2096 = vmatprep.mubr.msk.f32.mxu1 %vm2286_vm0, %v2285_v1 }
   0xf   :  { %2082 = vmatmul.mubr.f32.vlgmr.msra.gmra.mxu0 %v121_v15  ;;  %2104 = vmatprep.subr.mxu1 %v2285_v1 }
  0x10   :  { %2090 = vmatpush3.msra.mxu0 %v159_v6  ;;  %2091 = vmatprep.mubr.msk.f32.mxu0 %vm2286_vm0, %v2285_v1  ;;  %v1105_v6 = vsub.f32 %v2431_v61, %v1104_v2 }
  0x11   :  { %2099 = vmatprep.subr.mxu0 %v2285_v1  ;;  %2097 = vmatmul.mubr.f32.vlgmr.msra.gmra.mxu1 %v119_v12 }
  0x12   :  { %2105 = vmatpush3.msra.mxu1 %v82_v4  ;;  %2106 = vmatprep.mubr.msk.f32.mxu1 %vm2286_vm0, %v2285_v1  ;;  %v2447_v4 = vand.u32 4294901760, %v976_v63  ;;  %v1106_v9 = vand.u32 4294901760, %v1105_v6 }
  0x13   :  { %2092 = vmatmul.mubr.f32.vlgmr.msra.gmra.mxu0 %v118_v10  ;;  %2116 = vmatprep.subr.mxu1 %v2285_v1 }
  0x14   :  { %2100 = vmatpush3.msra.mxu0 %v160_v8  ;;  %2101 = vmatprep.mubr.msk.f32.mxu0 %vm2286_vm0, %v2285_v1  ;;  %v2456_v8 = vsub.f32 %v976_v63, %v2447_v4 }
  0x15   :  { %2107 = vmatmul.mubr.msk.f32.vlgmr.msra.gmra.mxu1 %vm47_vm1, %v1982_v7  ;;  %2109 = vmatprep.subr.mxu0 %v2285_v1 }
  0x16   :  { %2120 = vmatprep.mubr.msk.f32.mxu1 %vm2286_vm0, %v2285_v1  ;;  %2117 = vmatpush3.msra.mxu1 %v626_v25  ;;  %v1118_v11 = vand.u32 4294901760, %v2456_v8 }
  0x17   :  { %2102 = vmatmul.mubr.msk.f32.vlgmr.msra.gmra.mxu0 %vm47_vm1, %v1982_v7  ;;  %2118 = vmatprep.subr.mxu1 %v2285_v1  ;;  %v1111_v7 = vand.u32 4294901760, %v2445_v3 }
  0x18   :  { %2113 = vmatprep.mubr.msk.f32.mxu0 %vm2286_vm0, %v2285_v1  ;;  %2110 = vmatpush3.msra.mxu0 %v545_v17  ;;  %v1119_v13 = vsub.f32 %v2456_v8, %v1118_v11 }
  0x19   :  { %2111 = vmatprep.subr.mxu0 %v2285_v1  ;;  %2119 = vmatpush3.msra.mxu1 %v633_v27  ;;  %v1112_v10 = vsub.f32 %v2445_v3, %v1111_v7 }
  0x1a   :  { %2112 = vmatpush3.msra.mxu0 %v548_v20  ;;  %2130 = vmatprep.subr.mxu1 %v2285_v1  ;;  %v1120_v14 = vand.u32 4294901760, %v1119_v13 }
  0x1b   :  { %2123 = vmatprep.subr.mxu0 %v2285_v1  ;;  %v1113_v12 = vand.u32 4294901760, %v1112_v10 }
  0xcd   :  { %v199_v28 = vpop.f32.mrf.mxu1 }
  0xcf   :  { %v123_v29 = vpop.f32.mrf.mxu0  ;;  %v2088_v30 = vpop.f32.mrf.mxu1 }
  0xd0   :  { %v200_v33 = vadd.f32 %v199_v28, %v123_v29 }
  0xd1   :  { %v2083_v31 = vpop.f32.mrf.mxu0  ;;  %v347_v32 = vpop.f32.mrf.mxu1 }
  0xd3   :  { %v273_v34 = vpop.f32.mrf.mxu0  ;;  %v2098_v35 = vpop.f32.mrf.mxu1 }
  0xd4   :  { %v274_v36 = vadd.f32 %v273_v34, %v200_v33 }
  0xd5   :  { %v2093_v37 = vpop.f32.mrf.mxu0  ;;  %v493_v38 = vpop.f32.mrf.mxu1 }
  0xd6   :  { %v348_v39 = vadd.f32 %v347_v32, %v274_v36 }
  0xd7   :  { %v421_v40 = vpop.f32.mrf.mxu0  ;;  %v2108_v41 = vpop.f32.mrf.mxu1 }
  0xd8   :  { %v422_v42 = vadd.f32 %v421_v40, %v348_v39  ;;  %v1480_v41 = vld [vmem:[%s2640_s6 + $0x18] sm:$0xff] }
  0xd9   :  { %v2103_v44 = vpop.f32.mrf.mxu0 }
  0xda   :  { %v494_v45 = vadd.f32 %v493_v38, %v422_v42  ;;  %v2526_v42 = vand.u32 4294901760, %v1480_v41 }
  0xdc   :  { %v497_v46 = vadd.f32 %v494_v45, %v46_v43  ;;  %v1479_v43 = vld [vmem:[%s2640_s6 + $0x10] sm:$0xff]  ;;  %v2532_v44 = vsub.f32 %v1480_v41, %v2526_v42 }
  0xdd   :  { %v2534_v45 = vand.u32 4294901760, %v1479_v43 }
  0xde   :  { %499 = vst.msk [vmem:[#allocation2] sm:$0xff] %vm33_vm3, %v497_v46  ;;  %v1478_v46 = vld [vmem:[%s2640_s6 + $0x8] sm:$0xff] }
  0xe5   :  { %v503_v47 = vld [vmem:[#allocation2] sm:$0xff] }
  0xe6   :  { %v514_v48 = vsel %vm33_vm3, %v503_v47, 0  ;;  %v1597_v47 = vand.u32 4294901760, %v2532_v44 }
  0xe7   :  { %v583_v49 = vand.u32 4294901760, %v514_v48 }
  0xe9   :  { %v584_v50 = vsub.f32 %v514_v48, %v583_v49  ;;  %2121 = vmatmul.mubr.f32.vlgmr.msra.gmra.mxu1 %v583_v49  ;;  %v2543_v48 = vsub.f32 %v1479_v43, %v2534_v45 }
  0xea   :  { %2131 = vmatpush3.msra.mxu1 %v545_v17  ;;  %2134 = vmatprep.mubr.msk.f32.mxu1 %vm2286_vm0, %v2285_v1 }
  0xeb   :  { %2132 = vmatprep.subr.mxu1 %v2285_v1  ;;  %v585_v51 = vand.u32 4294901760, %v584_v50 }
  0xec   :  { %2133 = vmatpush3.msra.mxu1 %v548_v20 }
  0xed   :  { %2135 = vmatmul.mubr.f32.vlgmr.msra.gmra.mxu1 %v585_v51  ;;  %2144 = vmatprep.subr.mxu1 %v2285_v1  ;;  %v586_v52 = vsub.f32 %v584_v50, %v585_v51  ;;  %v1598_v51 = vsub.f32 %v2532_v44, %v1597_v47 }
  0xee   :  { %2145 = vmatpush3.msra.mxu1 %v545_v17  ;;  %2148 = vmatprep.mubr.msk.f32.mxu1 %vm2286_vm0, %v2285_v1 }
  0xef   :  { %2146 = vmatprep.subr.mxu1 %v2285_v1  ;;  %v587_v53 = vand.u32 4294901760, %v586_v52  ;;  %v1604_v52 = vand.u32 4294901760, %v2543_v48 }
  0xf0   :  { %2147 = vmatpush3.msra.mxu1 %v548_v20 }
  0xf1   :  { %2114 = vmatmul.mubr.f32.vlgmr.msra.gmra.mxu0 %v587_v53  ;;  %2149 = vmatmul.mubr.f32.vlgmr.msra.gmra.mxu1 %v583_v49  ;;  %v1605_v56 = vsub.f32 %v2543_v48, %v1604_v52 }
  0xf2   :  { %2124 = vmatpush3.msra.mxu0 %v2375_v19  ;;  %2127 = vmatprep.mubr.msk.f32.mxu0 %vm2286_vm0, %v2285_v1  ;;  %v1986_v19 = vld [vmem:[%s2639_s3] ss:$0 sm:$0xff] }
  0xf3   :  { %2125 = vmatprep.subr.mxu0 %v2285_v1  ;;  %2162 = vmatprep.subr.mxu1 %v2285_v1  ;;  %v1606_v59 = vand.u32 4294901760, %v1605_v56 }
  0xf4   :  { %2126 = vmatpush3.msra.mxu0 %v2379_v22  ;;  %2170 = vmatprep.mubr.msk.f32.mxu1 %vm2286_vm0, %v2285_v1 }
  0xf5   :  { %2137 = vmatprep.subr.mxu0 %v2285_v1  ;;  %2128 = vmatmul.mubr.f32.vlgmr.msra.gmra.mxu0 %v584_v50  ;;  %v1477_v50 = vld [vmem:[%s2640_s6] sm:$0xff] }
  0xf6   :  { %2138 = vmatpush3.msra.mxu0 %v624_v21  ;;  %2141 = vmatprep.mubr.msk.f32.mxu0 %vm2286_vm0, %v2285_v1  ;;  %v2559_v54 = vand.u32 4294901760, %v1477_v50 }
  0xf7   :  { %2139 = vmatprep.subr.mxu0 %v2285_v1  ;;  %2163 = vmatpush3.msra.mxu1 %v1099_v5 }
  0xf8   :  { %2140 = vmatpush3.msra.mxu0 %v631_v24  ;;  %2164 = vmatprep.subr.mxu1 %v2285_v1 }
  0xf9   :  { %2142 = vmatmul.mubr.f32.vlgmr.msra.gmra.mxu0 %v583_v49  ;;  %2151 = vmatprep.subr.mxu0 %v2285_v1  ;;  %v2545_v49 = vand.u32 4294901760, %v1478_v46 }
  0xfa   :  { %2159 = vmatprep.mubr.msk.f32.mxu0 %vm2286_vm0, %v2285_v1  ;;  %2152 = vmatpush3.msra.mxu0 %v2414_v55 }
  0xfb   :  { %2153 = vmatprep.subr.mxu0 %v2285_v1  ;;  %2165 = vmatpush3.msra.mxu1 %v1106_v9  ;;  %v2557_v53 = vsub.f32 %v1478_v46, %v2545_v49 }
  0xfc   :  { %2154 = vmatpush3.msra.mxu0 %v2422_v58  ;;  %2166 = vmatprep.subr.mxu1 %v2285_v1 }
  0xfd   :  { %2155 = vmatprep.subr.mxu0 %v2285_v1  ;;  %2167 = vmatpush3.msra.mxu1 %v1113_v12 }
  0xfe   :  { %2156 = vmatpush3.msra.mxu0 %v2433_v62  ;;  %2168 = vmatprep.subr.mxu1 %v2285_v1 }
  0xff   :  { %2157 = vmatprep.subr.mxu0 %v2285_v1  ;;  %2169 = vmatpush3.msra.mxu1 %v1120_v14 }
 0x100   :  { %2158 = vmatpush3.msra.mxu0 %v2447_v4  ;;  %2184 = vmatprep.subr.mxu1 %v2285_v1 }
 0x101   :  { %2173 = vmatprep.subr.mxu0 %v2285_v1 }
 0x1a9   :  { %v670_v15 = vpop.f32.mrf.mxu1 }
 0x1ab   :  { %v2122_v16 = vpop.f32.mrf.mxu1 }
 0x1ad   :  { %v821_v17 = vpop.f32.mrf.mxu1 }
 0x1af   :  { %v2136_v18 = vpop.f32.mrf.mxu1 }
 0x1b1   :  { %v589_v20 = vpop.f32.mrf.mxu0  ;;  %v971_v21 = vpop.f32.mrf.mxu1 }
 0x1b2   :  { %v590_v22 = vadd.f32 %v1986_v19, %v589_v20 }
 0x1b3   :  { %v2115_v23 = vpop.f32.mrf.mxu0  ;;  %v2150_v24 = vpop.f32.mrf.mxu1 }
 0x1b4   :  { %v671_v25 = vadd.f32 %v670_v15, %v590_v22 }
 0x1b5   :  { %v746_v26 = vpop.f32.mrf.mxu0 }
 0x1b6   :  { %v747_v27 = vadd.f32 %v746_v26, %v671_v25 }
 0x1b7   :  { %v2129_v28 = vpop.f32.mrf.mxu0 }
 0x1b8   :  { %v822_v29 = vadd.f32 %v821_v17, %v747_v27 }
 0x1b9   :  { %v898_v30 = vpop.f32.mrf.mxu0 }
 0x1ba   :  { %v899_v31 = vadd.f32 %v898_v30, %v822_v29 }
 0x1bb   :  { %v2143_v32 = vpop.f32.mrf.mxu0 }
 0x1bc   :  { %v972_v33 = vadd.f32 %v971_v21, %v899_v31 }
 0x1be   :  { %v975_v34 = vmax.f32 %v972_v33, 0.0 }
 0x1c0   :  { %v989_v35 = vsel %vm987_vm4, %v975_v34, 0  ;;  %v1988_v34 = vld [vmem:[%s2642_s7] ss:$0 sm:$0xff] }
 0x1c1   :  { %v1060_v36 = vand.u32 4294901760, %v989_v35 }
 0x1c3   :  { %v1061_v37 = vsub.f32 %v989_v35, %v1060_v36  ;;  %2171 = vmatmul.mubr.f32.vlgmr.msra.gmra.mxu1 %v1060_v36 }
 0x1c4   :  { %2185 = vmatpush3.msra.mxu1 %v2414_v55  ;;  %2192 = vmatprep.mubr.msk.f32.mxu1 %vm2286_vm0, %v2285_v1 }
 0x1c5   :  { %2186 = vmatprep.subr.mxu1 %v2285_v1  ;;  %v1062_v38 = vand.u32 4294901760, %v1061_v37 }
 0x1c6   :  { %2187 = vmatpush3.msra.mxu1 %v2422_v58 }
 0x1c7   :  { %2188 = vmatprep.subr.mxu1 %v2285_v1  ;;  %v1063_v39 = vsub.f32 %v1061_v37, %v1062_v38 }
 0x1c8   :  { %2189 = vmatpush3.msra.mxu1 %v2433_v62 }
 0x1c9   :  { %2190 = vmatprep.subr.mxu1 %v2285_v1  ;;  %v1064_v40 = vand.u32 4294901760, %v1063_v39 }
 0x1ca   :  { %2191 = vmatpush3.msra.mxu1 %v2447_v4 }
 0x1cb   :  { %2193 = vmatmul.mubr.f32.vlgmr.msra.gmra.mxu1 %v1062_v38  ;;  %2206 = vmatprep.subr.mxu1 %v2285_v1 }
 0x1cc   :  { %2160 = vmatmul.mubr.f32.vlgmr.msra.gmra.mxu0 %v1064_v40  ;;  %2207 = vmatpush3.msra.mxu1 %v2414_v55  ;;  %v1599_v55 = vand.u32 4294901760, %v1598_v51 }
 0x1cd   :  { %2174 = vmatpush3.msra.mxu0 %v2420_v57  ;;  %2208 = vmatprep.subr.mxu1 %v2285_v1  ;;  %v1611_v57 = vand.u32 4294901760, %v2557_v53 }
 0x1ce   :  { %2175 = vmatprep.subr.mxu0 %v2285_v1  ;;  %2209 = vmatpush3.msra.mxu1 %v2422_v58  ;;  %v2568_v58 = vsub.f32 %v1477_v50, %v2559_v54 }
 0x1cf   :  { %2176 = vmatpush3.msra.mxu0 %v2431_v61  ;;  %2210 = vmatprep.subr.mxu1 %v2285_v1 }
 0x1d0   :  { %2177 = vmatprep.subr.mxu0 %v2285_v1  ;;  %2211 = vmatpush3.msra.mxu1 %v2433_v62  ;;  %v1618_v61 = vand.u32 4294901760, %v2568_v58 }
 0x1d1   :  { %2178 = vmatpush3.msra.mxu0 %v2445_v3  ;;  %2212 = vmatprep.subr.mxu1 %v2285_v1 }
 0x1d2   :  { %2179 = vmatprep.subr.mxu0 %v2285_v1  ;;  %2181 = vmatprep.mubr.msk.f32.mxu0 %vm2286_vm0, %v2285_v1  ;;  %v1619_v63 = vsub.f32 %v2568_v58, %v1618_v61 }
 0x1d3   :  { %2180 = vmatpush3.msra.mxu0 %v2456_v8  ;;  %2213 = vmatpush3.msra.mxu1 %v2447_v4  ;;  %v1987_v8 = vld [vmem:[%s2641_s5] ss:$0 sm:$0xff] }
 0x1d4   :  { %2214 = vmatprep.mubr.msk.f32.mxu1 %vm2286_vm0, %v2285_v1  ;;  %2182 = vmatmul.mubr.f32.vlgmr.msra.gmra.mxu0 %v1061_v37  ;;  %v1620_v0 = vand.u32 4294901760, %v1619_v63 }
 0x1d5   :  { %2195 = vmatprep.subr.mxu0 %v2285_v1  ;;  %2215 = vmatmul.mubr.f32.vlgmr.msra.gmra.mxu1 %v1060_v36 }
 0x1d6   :  { %2196 = vmatpush3.msra.mxu0 %v1097_v60  ;;  %2203 = vmatprep.mubr.msk.f32.mxu0 %vm2286_vm0, %v2285_v1  ;;  %v1612_v60 = vsub.f32 %v2557_v53, %v1611_v57 }
 0x1d7   :  { %2197 = vmatprep.subr.mxu0 %v2285_v1  ;;  %2228 = vmatprep.subr.mxu1 %v2285_v1 }
 0x1d8   :  { %2198 = vmatpush3.msra.mxu0 %v1104_v2  ;;  %2236 = vmatprep.mubr.msk.f32.mxu1 %vm2286_vm0, %v2285_v1  ;;  %v1613_v62 = vand.u32 4294901760, %v1612_v60 }
 0x1d9   :  { %2199 = vmatprep.subr.mxu0 %v2285_v1  ;;  %2229 = vmatpush3.msra.mxu1 %v1599_v55 }
 0x1da   :  { %2200 = vmatpush3.msra.mxu0 %v1111_v7  ;;  %2230 = vmatprep.subr.mxu1 %v2285_v1 }
 0x1db   :  { %2201 = vmatprep.subr.mxu0 %v2285_v1  ;;  %2231 = vmatpush3.msra.mxu1 %v1606_v59 }
 0x1dc   :  { %2202 = vmatpush3.msra.mxu0 %v1118_v11  ;;  %2232 = vmatprep.subr.mxu1 %v2285_v1 }
 0x1dd   :  { %2204 = vmatmul.mubr.f32.vlgmr.msra.gmra.mxu0 %v1060_v36  ;;  %2217 = vmatprep.subr.mxu0 %v2285_v1 }
 0x1de   :  { %2225 = vmatprep.mubr.msk.f32.mxu0 %vm2286_vm0, %v2285_v1  ;;  %2218 = vmatpush3.msra.mxu0 %v2526_v42 }
 0x1df   :  { %2219 = vmatprep.subr.mxu0 %v2285_v1  ;;  %2233 = vmatpush3.msra.mxu1 %v1613_v62 }
 0x1e0   :  { %2220 = vmatpush3.msra.mxu0 %v2534_v45  ;;  %2234 = vmatprep.subr.mxu1 %v2285_v1 }
 0x1e1   :  { %2221 = vmatprep.subr.mxu0 %v2285_v1  ;;  %2235 = vmatpush3.msra.mxu1 %v1620_v0 }
 0x1e2   :  { %2222 = vmatpush3.msra.mxu0 %v2545_v49  ;;  %2250 = vmatprep.subr.mxu1 %v2285_v1 }
 0x1e3   :  { %2223 = vmatprep.subr.mxu0 %v2285_v1 }
 0x1e4   :  { %2224 = vmatpush3.msra.mxu0 %v2559_v54 }
 0x1e5   :  { %2239 = vmatprep.subr.mxu0 %v2285_v1 }
 0x283   :  { %v1157_v2 = vpop.f32.mrf.mxu1 }
 0x285   :  { %v2172_v3 = vpop.f32.mrf.mxu1 }
 0x28b   :  { %v1314_v4 = vpop.f32.mrf.mxu1 }
 0x28c   :  { %v1066_v5 = vpop.f32.mrf.mxu0 }
 0x28d   :  { %v2194_v6 = vpop.f32.mrf.mxu1  ;;  %v1067_v9 = vadd.f32 %v1987_v8, %v1066_v5 }
 0x28e   :  { %v2161_v7 = vpop.f32.mrf.mxu0 }
 0x28f   :  { %v1158_v12 = vadd.f32 %v1157_v2, %v1067_v9 }
 0x294   :  { %v1237_v10 = vpop.f32.mrf.mxu0 }
 0x295   :  { %v1472_v11 = vpop.f32.mrf.mxu1  ;;  %v1238_v15 = vadd.f32 %v1237_v10, %v1158_v12 }
 0x296   :  { %v2183_v13 = vpop.f32.mrf.mxu0 }
 0x297   :  { %v2216_v14 = vpop.f32.mrf.mxu1  ;;  %v1315_v16 = vadd.f32 %v1314_v4, %v1238_v15 }
 0x29d   :  { %v1397_v17 = vpop.f32.mrf.mxu0 }
 0x29e   :  { %v1398_v18 = vadd.f32 %v1397_v17, %v1315_v16 }
 0x29f   :  { %v2205_v19 = vpop.f32.mrf.mxu0 }
 0x2a0   :  { %v1473_v20 = vadd.f32 %v1472_v11, %v1398_v18 }
 0x2a2   :  { %v1476_v21 = vmax.f32 %v1473_v20, 0.0 }
 0x2a4   :  { %v1489_v22 = vsel %vm987_vm4, %v1476_v21, 0 }
 0x2a5   :  { %v1560_v23 = vand.u32 4294901760, %v1489_v22 }
 0x2a7   :  { %v1561_v24 = vsub.f32 %v1489_v22, %v1560_v23  ;;  %2237 = vmatmul.mubr.f32.vlgmr.msra.gmra.mxu1 %v1560_v23 }
 0x2a8   :  { %2251 = vmatpush3.msra.mxu1 %v2526_v42  ;;  %2258 = vmatprep.mubr.msk.f32.mxu1 %vm2286_vm0, %v2285_v1 }
 0x2a9   :  { %2252 = vmatprep.subr.mxu1 %v2285_v1  ;;  %v1562_v25 = vand.u32 4294901760, %v1561_v24 }
 0x2aa   :  { %2253 = vmatpush3.msra.mxu1 %v2534_v45 }
 0x2ab   :  { %2254 = vmatprep.subr.mxu1 %v2285_v1  ;;  %v1563_v26 = vsub.f32 %v1561_v24, %v1562_v25 }
 0x2ac   :  { %2255 = vmatpush3.msra.mxu1 %v2545_v49 }
 0x2ad   :  { %2256 = vmatprep.subr.mxu1 %v2285_v1  ;;  %v1564_v27 = vand.u32 4294901760, %v1563_v26 }
 0x2ae   :  { %2257 = vmatpush3.msra.mxu1 %v2559_v54 }
 0x2af   :  { %2259 = vmatmul.mubr.f32.vlgmr.msra.gmra.mxu1 %v1562_v25  ;;  %2272 = vmatprep.subr.mxu1 %v2285_v1 }
 0x2b0   :  { %2226 = vmatmul.mubr.f32.vlgmr.msra.gmra.mxu0 %v1564_v27  ;;  %2273 = vmatpush3.msra.mxu1 %v2526_v42 }
 0x2b1   :  { %2240 = vmatpush3.msra.mxu0 %v2532_v44  ;;  %2274 = vmatprep.subr.mxu1 %v2285_v1 }
 0x2b2   :  { %2241 = vmatprep.subr.mxu0 %v2285_v1  ;;  %2275 = vmatpush3.msra.mxu1 %v2534_v45 }
 0x2b3   :  { %2242 = vmatpush3.msra.mxu0 %v2543_v48  ;;  %2276 = vmatprep.subr.mxu1 %v2285_v1 }
 0x2b4   :  { %2243 = vmatprep.subr.mxu0 %v2285_v1  ;;  %2277 = vmatpush3.msra.mxu1 %v2545_v49 }
 0x2b5   :  { %2244 = vmatpush3.msra.mxu0 %v2557_v53  ;;  %2278 = vmatprep.subr.mxu1 %v2285_v1 }
 0x2b6   :  { %2245 = vmatprep.subr.mxu0 %v2285_v1  ;;  %2247 = vmatprep.mubr.msk.f32.mxu0 %vm2286_vm0, %v2285_v1 }
 0x2b7   :  { %2246 = vmatpush3.msra.mxu0 %v2568_v58  ;;  %2279 = vmatpush3.msra.mxu1 %v2559_v54 }
 0x2b8   :  { %2280 = vmatprep.mubr.msk.f32.mxu1 %vm2286_vm0, %v2285_v1  ;;  %2248 = vmatmul.mubr.f32.vlgmr.msra.gmra.mxu0 %v1561_v24 }
 0x2b9   :  { %2261 = vmatprep.subr.mxu0 %v2285_v1  ;;  %2281 = vmatmul.mubr.f32.vlgmr.msra.gmra.mxu1 %v1560_v23 }
 0x2ba   :  { %2262 = vmatpush3.msra.mxu0 %v1597_v47  ;;  %2269 = vmatprep.mubr.msk.f32.mxu0 %vm2286_vm0, %v2285_v1 }
 0x2bb   :  { %2263 = vmatprep.subr.mxu0 %v2285_v1 }
 0x2bc   :  { %2264 = vmatpush3.msra.mxu0 %v1604_v52 }
 0x2bd   :  { %2265 = vmatprep.subr.mxu0 %v2285_v1 }
 0x2be   :  { %2266 = vmatpush3.msra.mxu0 %v1611_v57 }
 0x2bf   :  { %2267 = vmatprep.subr.mxu0 %v2285_v1 }
 0x2c0   :  { %2268 = vmatpush3.msra.mxu0 %v1618_v61 }
 0x2c1   :  { %2270 = vmatmul.mubr.f32.vlgmr.msra.gmra.mxu0 %v1560_v23 }
 0x367   :  { %v1657_v28 = vpop.f32.mrf.mxu1 }
 0x369   :  { %v2238_v29 = vpop.f32.mrf.mxu1 }
 0x36f   :  { %v1814_v30 = vpop.f32.mrf.mxu1 }
 0x370   :  { %v1566_v31 = vpop.f32.mrf.mxu0 }
 0x371   :  { %v2260_v32 = vpop.f32.mrf.mxu1  ;;  %v1567_v35 = vadd.f32 %v1988_v34, %v1566_v31 }
 0x372   :  { %v2227_v33 = vpop.f32.mrf.mxu0 }
 0x373   :  { %v1658_v38 = vadd.f32 %v1657_v28, %v1567_v35 }
 0x378   :  { %v1737_v36 = vpop.f32.mrf.mxu0 }
 0x379   :  { %v1972_v37 = vpop.f32.mrf.mxu1  ;;  %v1738_v40 = vadd.f32 %v1737_v36, %v1658_v38 }
 0x37a   :  { %v2249_v39 = vpop.f32.mrf.mxu0 }
 0x37b   :  { %v2282_v1 = vpop.f32.mrf.mxu1  ;;  %v1815_v41 = vadd.f32 %v1814_v30, %v1738_v40 }
 0x381   :  { %v1897_v42 = vpop.f32.mrf.mxu0 }
 0x382   :  { %v1898_v43 = vadd.f32 %v1897_v42, %v1815_v41 }
 0x383   :  { %v2271_v44 = vpop.f32.mrf.mxu0 }
 0x384   :  { %v1973_v45 = vadd.f32 %v1972_v37, %v1898_v43 }
 0x386   :  { %1976 = vst [vmem:[%s2643_s8] sm:$0xff] %v1973_v45 }

</bundles_post_ra>
